<compile_context>
chip_gen: v6e
topology: v6e:2x2x1
jax: 0.10.0
libtpu: 0.0.40
codegen_flags: <defaults>
</compile_context>

<pallas_src>
import functools

import jax
import jax.numpy as jnp
from jax.experimental import pallas as pl
from jax.experimental.pallas import tpu as pltpu

_OUT_LANES = 128  # lane-dense output slab width


def _critic_kernel(training, *refs):
    """One grid step: a (TB, :) slice of the batch through the whole MLP."""
    if training:
        (s_ref, a_ref, w1s_ref, w1a_ref, b1_ref, w2_ref, b2_ref,
         w3_ref, b3_ref, m1_ref, m2_ref, out_ref) = refs
    else:
        (s_ref, a_ref, w1s_ref, w1a_ref, b1_ref, w2_ref, b2_ref,
         w3_ref, b3_ref, out_ref) = refs
        m1_ref = m2_ref = None

    # ---- linear1 (split-W1 accumulate, no concat needed) + relu + dropout ----
    h1 = jnp.dot(s_ref[...], w1s_ref[...], preferred_element_type=jnp.float32)
    h1 = h1 + jnp.dot(a_ref[...], w1a_ref[...], preferred_element_type=jnp.float32)
    h1 = h1 + b1_ref[...]
    h1 = jnp.maximum(h1, 0.0)
    if training:
        h1 = h1 * m1_ref[...]          # mask is 0.0 / 2.0 (p = 0.5, 1/(1-p) = 2)

    # ---- linear2 + relu + dropout ----
    h2 = jnp.dot(h1, w2_ref[...], preferred_element_type=jnp.float32) + b2_ref[...]
    h2 = jnp.maximum(h2, 0.0)
    if training:
        h2 = h2 * m2_ref[...]

    # ---- linear3 (lane-padded to 128 outputs; column 0 is the real q) ----
    out_ref[...] = (jnp.dot(h2, w3_ref[...], preferred_element_type=jnp.float32)
                    + b3_ref[...])


def _round_up(x, m):
    return (x + m - 1) // m * m


def critic_forward(params, state, action, *, key=None, training=True):
    """Pallas-backed forward pass of the Critic.  Returns (B, 1) float32."""
    state = state.astype(jnp.float32)
    action = action.astype(jnp.float32)
    B, Din = state.shape
    Da = action.shape[1]
    H = params["w2"].shape[0]

    # Batch tiling: TB multiple of 8 (sublane), capped at 128; pad batch if needed.
    TB = min(_round_up(B, 8), 128)
    Bp = _round_up(B, TB)
    if Bp != B:
        pad = Bp - B
        state = jnp.pad(state, ((0, pad), (0, 0)))
        action = jnp.pad(action, ((0, pad), (0, 0)))

    def act_spec(feat):               # streamed along the batch grid axis
        return pl.BlockSpec((TB, feat), lambda i: (i, 0))

    def w_spec(shape):                # VMEM-resident across all grid steps
        return pl.BlockSpec(shape, lambda i: (0, 0))

    in_specs = [
        act_spec(Din), act_spec(Da),
        w_spec((Din, H)), w_spec((Da, H)), w_spec((1, H)),
        w_spec((H, H)), w_spec((1, H)),
        w_spec((H, _OUT_LANES)), w_spec((1, _OUT_LANES)),
    ]
    args = [state, action,
            params["w1_s"], params["w1_a"], params["b1"],
            params["w2"], params["b2"],
            params["w3_pad"], params["b3_pad"]]

    if training:
        if key is None:
            key = jax.random.PRNGKey(0)
        k1, k2 = jax.random.split(key)
        # keep with prob 0.5, scale kept units by 1/(1-p) = 2.0
        scale1 = jax.random.bernoulli(k1, 0.5, (Bp, H)).astype(jnp.float32) * 2.0
        scale2 = jax.random.bernoulli(k2, 0.5, (Bp, H)).astype(jnp.float32) * 2.0
        in_specs += [act_spec(H), act_spec(H)]
        args += [scale1, scale2]

    kernel = functools.partial(_critic_kernel, training)

    out = pl.pallas_call(
        kernel,
        out_shape=jax.ShapeDtypeStruct((Bp, _OUT_LANES), jnp.float32),
        grid=(Bp // TB,),
        in_specs=in_specs,
        out_specs=pl.BlockSpec((TB, _OUT_LANES), lambda i: (i, 0)),
        compiler_params=pltpu.CompilerParams(
            dimension_semantics=("parallel",)),
    )(*args)

    return out[:B, :1]


def init_critic_params(key, input_dim, action_dim, hidden_size, init_w=3e-5):
    """Torch-style init: U(-1/sqrt(fan_in), ...) for linear1/2, U(-init_w, init_w)
    for linear3.  W1 is stored split (state / action halves); W3/b3 also stored
    zero-padded to 128 output lanes for the lane-dense kernel epilogue."""
    k1, k2, k3, k4, k5, k6 = jax.random.split(key, 6)
    fan1 = input_dim + action_dim
    bound1 = 1.0 / jnp.sqrt(fan1)
    bound2 = 1.0 / jnp.sqrt(hidden_size)

    w1 = jax.random.uniform(k1, (fan1, hidden_size), jnp.float32, -bound1, bound1)
    w3 = jax.random.uniform(k5, (hidden_size, 1), jnp.float32, -init_w, init_w)
    b3 = jax.random.uniform(k6, (1, 1), jnp.float32, -init_w, init_w)

    params = {
        "w1_s": w1[:input_dim],
        "w1_a": w1[input_dim:],
        "b1": jax.random.uniform(k2, (1, hidden_size), jnp.float32, -bound1, bound1),
        "w2": jax.random.uniform(k3, (hidden_size, hidden_size), jnp.float32,
                                 -bound2, bound2),
        "b2": jax.random.uniform(k4, (1, hidden_size), jnp.float32, -bound2, bound2),
        "w3": w3,
        "b3": b3,
        "w3_pad": jnp.pad(w3, ((0, 0), (0, _OUT_LANES - 1))),
        "b3_pad": jnp.pad(b3, ((0, 0), (0, _OUT_LANES - 1))),
    }
    return params


def critic_reference(params, state, action):
    """Pure-JAX reference (eval mode: dropout = identity)."""
    x = jnp.concatenate([state, action], axis=1)
    w1 = jnp.concatenate([params["w1_s"], params["w1_a"]], axis=0)
    h1 = jnp.maximum(x @ w1 + params["b1"], 0.0)
    h2 = jnp.maximum(h1 @ params["w2"] + params["b2"], 0.0)
    return h2 @ params["w3"] + params["b3"]


if __name__ == "__main__":
    # Small shapes consistent with the module: batch=8, state=16, action=8, hidden=32.
    B, INPUT_DIM, ACTION_DIM, HIDDEN = 8, 16, 8, 32

    root = jax.random.PRNGKey(0)
    kp, ks, ka, kd = jax.random.split(root, 4)

    params = init_critic_params(kp, INPUT_DIM, ACTION_DIM, HIDDEN)
    state = jax.random.normal(ks, (B, INPUT_DIM), jnp.float32)
    action = jax.random.normal(ka, (B, ACTION_DIM), jnp.float32)

    # Training-mode forward (dropout active, fused relu*mask inside the kernel).
    q_train = critic_forward(params, state, action, key=kd, training=True)
    q_train = jax.block_until_ready(q_train)
    assert q_train.shape == (B, 1)
    assert bool(jnp.all(jnp.isfinite(q_train)))

    # Eval-mode forward (dropout disabled) checked against pure-JAX reference.
    q_eval = critic_forward(params, state, action, training=False)
    q_eval = jax.block_until_ready(q_eval)
    q_ref = critic_reference(params, state, action)
    assert q_eval.shape == (B, 1)
    assert jnp.allclose(q_eval, q_ref, atol=1e-5, rtol=1e-4), "eval-mode mismatch"

    print("KERNEL_OK")
</pallas_src>

<mosaic_0001>
module attributes {stable_mosaic.version = 11 : i64} {
  func.func @_critic_kernel(%arg0: i32, %arg1: memref<8x16xf32, #tpu.memory_space<vmem>>, %arg2: memref<8x8xf32, #tpu.memory_space<vmem>>, %arg3: memref<16x32xf32, #tpu.memory_space<vmem>>, %arg4: memref<8x32xf32, #tpu.memory_space<vmem>>, %arg5: memref<1x32xf32, #tpu.memory_space<vmem>>, %arg6: memref<32x32xf32, #tpu.memory_space<vmem>>, %arg7: memref<1x32xf32, #tpu.memory_space<vmem>>, %arg8: memref<32x128xf32, #tpu.memory_space<vmem>>, %arg9: memref<1x128xf32, #tpu.memory_space<vmem>>, %arg10: memref<8x32xf32, #tpu.memory_space<vmem>>, %arg11: memref<8x32xf32, #tpu.memory_space<vmem>>, %arg12: memref<8x128xf32, #tpu.memory_space<vmem>>) attributes {dimension_semantics = [#tpu.dimension_semantics<parallel>], iteration_bounds = array<i64: 1>, scalar_prefetch = 0 : i64, scratch_operands = 0 : i64, tpu.core_type = #tpu.core_type<tc>, window_params = [{transform_indices = @transform_0, window_bounds = array<i64: 8, 16>}, {transform_indices = @transform_1, window_bounds = array<i64: 8, 8>}, {pipeline_mode = #tpu.pipeline_mode<synchronous>, transform_indices = @transform_2, window_bounds = array<i64: 16, 32>}, {pipeline_mode = #tpu.pipeline_mode<synchronous>, transform_indices = @transform_3, window_bounds = array<i64: 8, 32>}, {pipeline_mode = #tpu.pipeline_mode<synchronous>, transform_indices = @transform_4, window_bounds = array<i64: 1, 32>}, {pipeline_mode = #tpu.pipeline_mode<synchronous>, transform_indices = @transform_5, window_bounds = array<i64: 32, 32>}, {pipeline_mode = #tpu.pipeline_mode<synchronous>, transform_indices = @transform_6, window_bounds = array<i64: 1, 32>}, {pipeline_mode = #tpu.pipeline_mode<synchronous>, transform_indices = @transform_7, window_bounds = array<i64: 32, 128>}, {pipeline_mode = #tpu.pipeline_mode<synchronous>, transform_indices = @transform_8, window_bounds = array<i64: 1, 128>}, {transform_indices = @transform_9, window_bounds = array<i64: 8, 32>}, {transform_indices = @transform_10, window_bounds = array<i64: 8, 32>}, {transform_indices = @transform_11, window_bounds = array<i64: 8, 128>}]} {
    %c0 = arith.constant 0 : index
    %c0_0 = arith.constant 0 : index
    %0 = vector.load %arg1[%c0, %c0_0] : memref<8x16xf32, #tpu.memory_space<vmem>>, vector<8x16xf32>
    %c0_1 = arith.constant 0 : index
    %c0_2 = arith.constant 0 : index
    %1 = vector.load %arg3[%c0_1, %c0_2] : memref<16x32xf32, #tpu.memory_space<vmem>>, vector<16x32xf32>
    %cst = arith.constant dense<0.000000e+00> : vector<8x32xf32>
    %2 = tpu.matmul %0, %1, %cst {dimension_numbers = #tpu.dot_dimension_numbers<[1], [0], [0], [1], [0, 0, 1, 1], [], []>} : vector<8x16xf32>, vector<16x32xf32>, vector<8x32xf32> -> vector<8x32xf32>
    %c0_3 = arith.constant 0 : index
    %c0_4 = arith.constant 0 : index
    %3 = vector.load %arg2[%c0_3, %c0_4] : memref<8x8xf32, #tpu.memory_space<vmem>>, vector<8x8xf32>
    %c0_5 = arith.constant 0 : index
    %c0_6 = arith.constant 0 : index
    %4 = vector.load %arg4[%c0_5, %c0_6] : memref<8x32xf32, #tpu.memory_space<vmem>>, vector<8x32xf32>
    %cst_7 = arith.constant dense<0.000000e+00> : vector<8x32xf32>
    %5 = tpu.matmul %3, %4, %cst_7 {dimension_numbers = #tpu.dot_dimension_numbers<[1], [0], [0], [1], [0, 0, 1, 1], [], []>} : vector<8x8xf32>, vector<8x32xf32>, vector<8x32xf32> -> vector<8x32xf32>
    %6 = arith.addf %2, %5 : vector<8x32xf32>
    %c0_8 = arith.constant 0 : index
    %c0_9 = arith.constant 0 : index
    %7 = vector.load %arg5[%c0_8, %c0_9] : memref<1x32xf32, #tpu.memory_space<vmem>>, vector<1x32xf32>
    %8 = vector.broadcast %7 : vector<1x32xf32> to vector<8x32xf32>
    %9 = arith.addf %6, %8 : vector<8x32xf32>
    %cst_10 = arith.constant 0.000000e+00 : f32
    %10 = vector.broadcast %cst_10 : f32 to vector<8x32xf32>
    %11 = arith.maximumf %9, %10 : vector<8x32xf32>
    %c0_11 = arith.constant 0 : index
    %c0_12 = arith.constant 0 : index
    %12 = vector.load %arg10[%c0_11, %c0_12] : memref<8x32xf32, #tpu.memory_space<vmem>>, vector<8x32xf32>
    %13 = arith.mulf %11, %12 : vector<8x32xf32>
    %c0_13 = arith.constant 0 : index
    %c0_14 = arith.constant 0 : index
    %14 = vector.load %arg6[%c0_13, %c0_14] : memref<32x32xf32, #tpu.memory_space<vmem>>, vector<32x32xf32>
    %cst_15 = arith.constant dense<0.000000e+00> : vector<8x32xf32>
    %15 = tpu.matmul %13, %14, %cst_15 {dimension_numbers = #tpu.dot_dimension_numbers<[1], [0], [0], [1], [0, 0, 1, 1], [], []>} : vector<8x32xf32>, vector<32x32xf32>, vector<8x32xf32> -> vector<8x32xf32>
    %c0_16 = arith.constant 0 : index
    %c0_17 = arith.constant 0 : index
    %16 = vector.load %arg7[%c0_16, %c0_17] : memref<1x32xf32, #tpu.memory_space<vmem>>, vector<1x32xf32>
    %17 = vector.broadcast %16 : vector<1x32xf32> to vector<8x32xf32>
    %18 = arith.addf %15, %17 : vector<8x32xf32>
    %cst_18 = arith.constant 0.000000e+00 : f32
    %19 = vector.broadcast %cst_18 : f32 to vector<8x32xf32>
    %20 = arith.maximumf %18, %19 : vector<8x32xf32>
    %c0_19 = arith.constant 0 : index
    %c0_20 = arith.constant 0 : index
    %21 = vector.load %arg11[%c0_19, %c0_20] : memref<8x32xf32, #tpu.memory_space<vmem>>, vector<8x32xf32>
    %22 = arith.mulf %20, %21 : vector<8x32xf32>
    %c0_21 = arith.constant 0 : index
    %c0_22 = arith.constant 0 : index
    %23 = vector.load %arg8[%c0_21, %c0_22] : memref<32x128xf32, #tpu.memory_space<vmem>>, vector<32x128xf32>
    %cst_23 = arith.constant dense<0.000000e+00> : vector<8x128xf32>
    %24 = tpu.matmul %22, %23, %cst_23 {dimension_numbers = #tpu.dot_dimension_numbers<[1], [0], [0], [1], [0, 0, 1, 1], [], []>} : vector<8x32xf32>, vector<32x128xf32>, vector<8x128xf32> -> vector<8x128xf32>
    %c0_24 = arith.constant 0 : index
    %c0_25 = arith.constant 0 : index
    %25 = vector.load %arg9[%c0_24, %c0_25] : memref<1x128xf32, #tpu.memory_space<vmem>>, vector<1x128xf32>
    %26 = vector.broadcast %25 : vector<1x128xf32> to vector<8x128xf32>
    %27 = arith.addf %24, %26 : vector<8x128xf32>
    %c0_26 = arith.constant 0 : index
    %c0_27 = arith.constant 0 : index
    %28 = vector.load %arg12[%c0_26, %c0_27] : memref<8x128xf32, #tpu.memory_space<vmem>>, vector<8x128xf32>
    tpu.vector_store %arg12[%c0_26, %c0_27], %27 {strides = array<i32>} : memref<8x128xf32, #tpu.memory_space<vmem>>, vector<8x128xf32>,
    return
  }
  func.func @transform_0(%arg0: i32) -> (i32, i32) {
    %c0_i32 = arith.constant 0 : i32
    %c0_i32_0 = arith.constant 0 : i32
    return %arg0, %c0_i32 : i32, i32
  }
  func.func @transform_1(%arg0: i32) -> (i32, i32) {
    %c0_i32 = arith.constant 0 : i32
    %c0_i32_0 = arith.constant 0 : i32
    return %arg0, %c0_i32 : i32, i32
  }
  func.func @transform_2(%arg0: i32) -> (i32, i32) {
    %c0_i32 = arith.constant 0 : i32
    %c0_i32_0 = arith.constant 0 : i32
    %c0_i32_1 = arith.constant 0 : i32
    return %c0_i32, %c0_i32_0 : i32, i32
  }
  func.func @transform_3(%arg0: i32) -> (i32, i32) {
    %c0_i32 = arith.constant 0 : i32
    %c0_i32_0 = arith.constant 0 : i32
    %c0_i32_1 = arith.constant 0 : i32
    return %c0_i32, %c0_i32_0 : i32, i32
  }
  func.func @transform_4(%arg0: i32) -> (i32, i32) {
    %c0_i32 = arith.constant 0 : i32
    %c0_i32_0 = arith.constant 0 : i32
    %c0_i32_1 = arith.constant 0 : i32
    return %c0_i32, %c0_i32_0 : i32, i32
  }
  func.func @transform_5(%arg0: i32) -> (i32, i32) {
    %c0_i32 = arith.constant 0 : i32
    %c0_i32_0 = arith.constant 0 : i32
    %c0_i32_1 = arith.constant 0 : i32
    return %c0_i32, %c0_i32_0 : i32, i32
  }
  func.func @transform_6(%arg0: i32) -> (i32, i32) {
    %c0_i32 = arith.constant 0 : i32
    %c0_i32_0 = arith.constant 0 : i32
    %c0_i32_1 = arith.constant 0 : i32
    return %c0_i32, %c0_i32_0 : i32, i32
  }
  func.func @transform_7(%arg0: i32) -> (i32, i32) {
    %c0_i32 = arith.constant 0 : i32
    %c0_i32_0 = arith.constant 0 : i32
    %c0_i32_1 = arith.constant 0 : i32
    return %c0_i32, %c0_i32_0 : i32, i32
  }
  func.func @transform_8(%arg0: i32) -> (i32, i32) {
    %c0_i32 = arith.constant 0 : i32
    %c0_i32_0 = arith.constant 0 : i32
    %c0_i32_1 = arith.constant 0 : i32
    return %c0_i32, %c0_i32_0 : i32, i32
  }
  func.func @transform_9(%arg0: i32) -> (i32, i32) {
    %c0_i32 = arith.constant 0 : i32
    %c0_i32_0 = arith.constant 0 : i32
    return %arg0, %c0_i32 : i32, i32
  }
  func.func @transform_10(%arg0: i32) -> (i32, i32) {
    %c0_i32 = arith.constant 0 : i32
    %c0_i32_0 = arith.constant 0 : i32
    return %arg0, %c0_i32 : i32, i32
  }
  func.func @transform_11(%arg0: i32) -> (i32, i32) {
    %c0_i32 = arith.constant 0 : i32
    %c0_i32_0 = arith.constant 0 : i32
    return %arg0, %c0_i32 : i32, i32
  }
}

</mosaic_0001>

<bundles_post_ra>
// kernel: tpu_custom_call.1
= control target key start
LH: loop header
LB: loop body
LE: loop exit
PB: predicated region body
PF: predicated region fallthrough
CT: control target
= control target key end

     0   :  { %16 = vsyncpa [#allocation3], 0  ;;  %s912_s0 = inlined_call_operand.hbm [shape: f32[8,16], index: 0, kind: input, shape index: {}]   ;;  %s913_s1 = inlined_call_operand.hbm [shape: f32[8,8], index: 1, kind: input, shape index: {}]   ;;  %s914_s2 = inlined_call_operand.hbm [shape: f32[16,32], index: 2, kind: input, shape index: {}]   ;;  %s915_s3 = inlined_call_operand.hbm [shape: f32[8,32], index: 3, kind: input, shape index: {}]   ;;  %s916_s4 = inlined_call_operand.hbm [shape: f32[1,32], index: 4, kind: input, shape index: {}]   ;;  %s917_s5 = inlined_call_operand.hbm [shape: f32[32,32], index: 5, kind: input, shape index: {}]   ;;  %s918_s6 = inlined_call_operand.hbm [shape: f32[1,32], index: 6, kind: input, shape index: {}]   ;;  %s919_s7 = inlined_call_operand.hbm [shape: f32[32,128], index: 7, kind: input, shape index: {}]   ;;  %s920_s8 = inlined_call_operand.hbm [shape: f32[1,128], index: 8, kind: input, shape index: {}]   ;;  %s921_s9 = inlined_call_operand.vmem [shape: f32[8,32], index: 9, kind: input, shape index: {}]   ;;  %s922_s10 = inlined_call_operand.vmem [shape: f32[8,32], index: 10, kind: input, shape index: {}]   ;;  %s923_s11 = inlined_call_operand.hbm [shape: f32[8,128], index: 11, kind: output, shape index: {}]  }
   0x1   :  { %17 = vsyncpa [#allocation6], 0 }
   0x2   :  { %18 = vsyncpa [#allocation9], 0 }
   0x3   :  { %19 = vsyncpa [#allocation12], 0 }
   0x4   :  { %20 = vsyncpa [#allocation15], 0 }
   0x5   :  { %21 = vsyncpa [#allocation4], 0  ;;  %s787_s17 = smov [#allocation5]   ;;  %s788_s19 = smov [#allocation8]  }
   0x6   :  { %s38_s18 = sshll.u32 %s787_s17, 4  ;;  %s60_s20 = sshll.u32 %s788_s19, 4  ;;  %s39_s18 = int_to_ptr.vmem [resolvable:$true] %s38_s18  ;;  %s61_s20 = int_to_ptr.vmem [resolvable:$true] %s60_s20 }
   0x7   :  { %s583_s21 = scalar_lea.vmem %s39_s18, 128  ;;  %p588_p1 = scmp.lt.s32.totalorder %s39_s18, %s39_s18 }
   0x8   :  { %p584_p0 = scmp.ne.s32.totalorder %s39_s18, %s583_s21  ;;  %p589_p2 = scmp.lt.s32.totalorder %s583_s21, %s583_s21 }
   0xa   :  { %p590_p3 = por %p589_p2, %p588_p1 }
   0xc   :  { %p591_p4 = pnand %p590_p3, %p584_p0 }
   0xe   :  { %594 = shalt.err (!%p591_p4)
}
   0xf   :  { %41 = dma.hbm_to_vmem [thread:$0]  %s913_s1, 128, %s39_s18, [#allocation6]  }
  0x10   :  { %s603_s24 = scalar_lea.vmem %s61_s20, 128  ;;  %p608_p6 = scmp.lt.s32.totalorder %s61_s20, %s61_s20 }
  0x11   :  { %p604_p5 = scmp.ne.s32.totalorder %s61_s20, %s603_s24  ;;  %p609_p7 = scmp.lt.s32.totalorder %s603_s24, %s603_s24 }
  0x13   :  { %p610_p8 = por %p609_p7, %p608_p6 }
  0x15   :  { %p611_p9 = pnand %p610_p8, %p604_p5 }
  0x17   :  { %614 = shalt.err (!%p611_p9)
}
  0x18   :  { %63 = dma.hbm_to_vmem [thread:$0]  %s915_s3, 128, %s61_s20, [#allocation9]  }
  0x19   :  { %s789_s27 = smov [#allocation11]   ;;  %s790_s29 = smov [#allocation14]  }
  0x1a   :  { %s79_s28 = sshll.u32 %s789_s27, 4  ;;  %s101_s30 = sshll.u32 %s790_s29, 4  ;;  %s80_s28 = int_to_ptr.vmem [resolvable:$true] %s79_s28  ;;  %s102_s30 = int_to_ptr.vmem [resolvable:$true] %s101_s30 }
  0x1b   :  { %s623_s12 = scalar_lea.vmem %s80_s28, 512  ;;  %p628_p11 = scmp.lt.s32.totalorder %s80_s28, %s80_s28 }
  0x1c   :  { %p624_p10 = scmp.ne.s32.totalorder %s80_s28, %s623_s12  ;;  %p629_p12 = scmp.lt.s32.totalorder %s623_s12, %s623_s12 }
  0x1e   :  { %p630_p13 = por %p629_p12, %p628_p11 }
  0x20   :  { %p631_p0 = pnand %p630_p13, %p624_p10 }
  0x22   :  { %634 = shalt.err (!%p631_p0)
}
  0x23   :  { %s791_s1 = smov 128   ;;  %s792_s13 = smov 8  }
  0x24   :  { %85 = dma.hbm_to_vmem [thread:$0]  %s917_s5, 512, %s80_s28, [#allocation12], %s791_s1, %s791_s1, %s792_s13  }
  0x25   :  { %s643_s15 = scalar_lea.vmem %s102_s30, 512  ;;  %p648_p2 = scmp.lt.s32.totalorder %s102_s30, %s102_s30 }
  0x26   :  { %p644_p1 = scmp.ne.s32.totalorder %s102_s30, %s643_s15  ;;  %p649_p3 = scmp.lt.s32.totalorder %s643_s15, %s643_s15 }
  0x28   :  { %p650_p4 = por %p649_p3, %p648_p2 }
  0x2a   :  { %p651_p5 = pnand %p650_p4, %p644_p1 }
  0x2c   :  { %654 = shalt.err (!%p651_p5)
}
  0x2d   :  { %107 = dma.hbm_to_vmem [thread:$0]  %s919_s7, 512, %s102_s30, [#allocation15], %s791_s1, %s791_s1, %s792_s13  }
  0x2e   :  { %s793_s18 = smov [#allocation2]   ;;  %s794_s20 = smov [#allocation7]  }
  0x2f   :  { %s28_s19 = sshll.u32 %s793_s18, 4  ;;  %s47_s21 = sshll.u32 %s794_s20, 4  ;;  %s29_s19 = int_to_ptr.vmem [resolvable:$true] %s28_s19  ;;  %s48_s21 = int_to_ptr.vmem [resolvable:$true] %s47_s21 }
  0x30   :  { %s663_s5 = scalar_lea.vmem %s29_s19, 128  ;;  %p668_p7 = scmp.lt.s32.totalorder %s29_s19, %s29_s19 }
  0x31   :  { %p664_p6 = scmp.ne.s32.totalorder %s29_s19, %s663_s5  ;;  %p669_p8 = scmp.lt.s32.totalorder %s663_s5, %s663_s5 }
  0x33   :  { %p670_p9 = por %p669_p8, %p668_p7 }
  0x35   :  { %p671_p10 = pnand %p670_p9, %p664_p6 }
  0x37   :  { %674 = shalt.err (!%p671_p10)
}
  0x38   :  { %31 = dma.hbm_to_vmem [thread:$0]  %s912_s0, 128, %s29_s19, [#allocation3]  }
  0x39   :  { %s683_s24 = scalar_lea.vmem %s48_s21, 256  ;;  %p688_p12 = scmp.lt.s32.totalorder %s48_s21, %s48_s21 }
  0x3a   :  { %p684_p11 = scmp.ne.s32.totalorder %s48_s21, %s683_s24  ;;  %p689_p13 = scmp.lt.s32.totalorder %s683_s24, %s683_s24 }
  0x3c   :  { %p690_p0 = por %p689_p13, %p688_p12 }
  0x3e   :  { %p691_p1 = pnand %p690_p0, %p684_p11 }
  0x40   :  { %694 = shalt.err (!%p691_p1)
}
  0x41   :  { %53 = dma.hbm_to_vmem [thread:$0]  %s914_s2, 256, %s48_s21, [#allocation6], %s791_s1, %s791_s1, %s792_s13  }
  0x42   :  { %s795_s26 = smov [#allocation10]   ;;  %s796_s28 = smov [#allocation13]  }
  0x43   :  { %s70_s27 = sshll.u32 %s795_s26, 4  ;;  %s92_s29 = sshll.u32 %s796_s28, 4  ;;  %s71_s27 = int_to_ptr.vmem [resolvable:$true] %s70_s27  ;;  %s93_s29 = int_to_ptr.vmem [resolvable:$true] %s92_s29 }
  0x44   :  { %s703_s0 = scalar_lea.vmem %s71_s27, 16  ;;  %s707_s30 = scalar_lea.vmem %s71_s27, 32 }
  0x45   :  { %p704_p2 = scmp.ne.s32.totalorder %s71_s27, %s703_s0  ;;  %p708_p3 = scmp.lt.s32.totalorder %s71_s27, %s71_s27 }
  0x46   :  { %p709_p4 = scmp.lt.s32.totalorder %s707_s30, %s703_s0 }
  0x48   :  { %p710_p5 = por %p709_p4, %p708_p3 }
  0x4a   :  { %p711_p6 = pnand %p710_p5, %p704_p2 }
  0x4c   :  { %714 = shalt.err (!%p711_p6)
}
  0x4d   :  { %73 = dma.hbm_to_vmem [thread:$0]  %s916_s4, 16, %s71_s27, [#allocation9]  }
  0x4e   :  { %s723_s3 = scalar_lea.vmem %s93_s29, 16  ;;  %s727_s2 = scalar_lea.vmem %s93_s29, 32 }
  0x4f   :  { %p724_p7 = scmp.ne.s32.totalorder %s93_s29, %s723_s3  ;;  %p728_p8 = scmp.lt.s32.totalorder %s93_s29, %s93_s29 }
  0x50   :  { %p729_p9 = scmp.lt.s32.totalorder %s727_s2, %s723_s3 }
  0x52   :  { %p730_p10 = por %p729_p9, %p728_p8 }
  0x54   :  { %p731_p11 = pnand %p730_p10, %p724_p7 }
  0x56   :  { %734 = shalt.err (!%p731_p11)
}
  0x57   :  { %95 = dma.hbm_to_vmem [thread:$0]  %s918_s6, 16, %s93_s29, [#allocation12]  }
  0x58   :  { %s797_s15 = smov [#allocation16]  }
  0x59   :  { %s114_s16 = sshll.u32 %s797_s15, 4  ;;  %s115_s16 = int_to_ptr.vmem [resolvable:$true] %s114_s16 }
  0x5a   :  { %s743_s17 = scalar_lea.vmem %s115_s16, 16  ;;  %s747_s18 = scalar_lea.vmem %s115_s16, 32 }
  0x5b   :  { %p744_p12 = scmp.ne.s32.totalorder %s115_s16, %s743_s17  ;;  %p748_p13 = scmp.lt.s32.totalorder %s115_s16, %s115_s16 }
  0x5c   :  { %p749_p0 = scmp.lt.s32.totalorder %s747_s18, %s743_s17 }
  0x5e   :  { %p750_p1 = por %p749_p0, %p748_p13 }
  0x60   :  { %p751_p2 = pnand %p750_p1, %p744_p12 }
  0x62   :  { %754 = shalt.err (!%p751_p2)
}
  0x63   :  { %117 = dma.hbm_to_vmem [thread:$0]  %s920_s8, 16, %s115_s16, [#allocation15]  }
  0x64   :  { %775 = dma.done.wait [#allocation3], 128  }
  0x65   :  { %776 = vsyncadd [#allocation3], 4294967168 }
  0x66   :  { %777 = dma.done.wait [#allocation6], 384  }
  0x67   :  { %778 = vsyncadd [#allocation6], 4294966912 }
  0x68   :  { %779 = dma.done.wait [#allocation9], 144  }
  0x69   :  { %780 = vsyncadd [#allocation9], 4294967152 }
  0x6a   :  { %781 = dma.done.wait [#allocation12], 528  }
  0x6b   :  { %782 = vsyncadd [#allocation12], 4294966768 }
  0x6c   :  { %783 = dma.done.wait [#allocation15], 528  }
  0x6d   :  { %784 = vsyncadd [#allocation15], 4294966768  ;;  %v798_v0 = vmov 0.0   ;;  %vm799_vm0 = vmmov 0   ;;  %vm154_vm1 = vcmask 64512   ;;  %v153_v1 = vld [vmem:[#allocation8] sm:$0xff] }
  0x6e   :  { %527 = vmatprep.subr.mxu0 %v798_v0  ;;  %532 = vmatprep.subr.mxu1 %v798_v0  ;;  %v151_v2 = vld [vmem:[#allocation7 + $0x8] sm:$0xff]  ;;  %v152_v3 = vld [vmem:[#allocation5] sm:$0xff]  ;;  %v150_v4 = vld [vmem:[#allocation7] sm:$0xff]  ;;  %vm228_vm2 = vcmask 130048   ;;  %vm324_vm3 = vcmask 261120   ;;  %s800_s21 = smov [#allocation17]  }
  0x6f   :  { %529 = vmatprep.mubr.msk.f32.mxu0 %vm799_vm0, %v798_v0  ;;  %536 = vmatprep.mubr.msk.f32.mxu1 %vm799_vm0, %v798_v0  ;;  %v149_v5 = vld [vmem:[#allocation2] sm:$0xff]  ;;  %v314_v8 = vld [vmem:[#allocation11 + $0x8] sm:$0xff]  ;;  %v313_v9 = vld [vmem:[#allocation11] sm:$0xff]  ;;  %s492_s5 = sshll.u32 %s800_s21, 4  ;;  %s493_s5 = int_to_ptr.vmem [resolvable:$true] %s492_s5 }
  0x70   :  { %528 = vmatpush3.msra.mxu0 %v153_v1  ;;  %533 = vmatpush3.msra.mxu1 %v151_v2  ;;  %v316_v6 = vld [vmem:[#allocation11 + $0x18] sm:$0xff]  ;;  %v315_v7 = vld [vmem:[#allocation11 + $0x10] sm:$0xff]  ;;  %v401_v23 = vld [vmem:[#allocation14] sm:$0xff]  ;;  %s755_s22 = scalar_lea.vmem %s493_s5, 128  ;;  %p760_p4 = scmp.lt.s32.totalorder %s493_s5, %s493_s5 }
  0x71   :  { %530 = vmatmul.mubr.msk.f32.vlgmr.msra.gmra.mxu0 %vm154_vm1, %v152_v3  ;;  %534 = vmatprep.subr.mxu1 %v798_v0  ;;  %v507_v13 = vld [vmem:[#allocation10] ss:$0 sm:$0xff]  ;;  %v311_v17 = vld [vmem:[%s921_s9] sm:$0xff]  ;;  %v402_v22 = vld [vmem:[#allocation14 + $0x8] sm:$0xff]  ;;  %p756_p3 = scmp.ne.s32.totalorder %s493_s5, %s755_s22  ;;  %p761_p5 = scmp.lt.s32.totalorder %s755_s22, %s755_s22 }
  0x72   :  { %535 = vmatpush3.msra.mxu1 %v150_v4  ;;  %539 = vmatprep.subr.mxu0 %v798_v0  ;;  %v404_v20 = vld [vmem:[#allocation14 + $0x18] sm:$0xff]  ;;  %v403_v21 = vld [vmem:[#allocation14 + $0x10] sm:$0xff]  ;;  %v510_v31 = vld [vmem:[#allocation16] ss:$0 sm:$0xff] }
  0x73   :  { %537 = vmatmul.mubr.msk.f32.vlgmr.msra.gmra.mxu1 %vm228_vm2, %v149_v5  ;;  %547 = vmatprep.mubr.msk.f32.mxu0 %vm799_vm0, %v798_v0  ;;  %v508_v24 = vld [vmem:[#allocation13] ss:$0 sm:$0xff]  ;;  %v399_v27 = vld [vmem:[%s922_s10] sm:$0xff]  ;;  %p762_p6 = por %p761_p5, %p760_p4 }
  0x74   :  { %550 = vmatprep.subr.mxu1 %v798_v0  ;;  %558 = vmatprep.mubr.msk.f32.mxu1 %vm799_vm0, %v798_v0 }
  0x75   :  { %540 = vmatpush3.msra.mxu0 %v316_v6  ;;  %551 = vmatpush3.msra.mxu1 %v404_v20  ;;  %p763_p7 = pnand %p762_p6, %p756_p3 }
  0x76   :  { %541 = vmatprep.subr.mxu0 %v798_v0  ;;  %552 = vmatprep.subr.mxu1 %v798_v0 }
  0x77   :  { %542 = vmatpush3.msra.mxu0 %v315_v7  ;;  %553 = vmatpush3.msra.mxu1 %v403_v21 }
  0x78   :  { %543 = vmatprep.subr.mxu0 %v798_v0  ;;  %554 = vmatprep.subr.mxu1 %v798_v0 }
  0x79   :  { %544 = vmatpush3.msra.mxu0 %v314_v8  ;;  %555 = vmatpush3.msra.mxu1 %v402_v22 }
  0x7a   :  { %545 = vmatprep.subr.mxu0 %v798_v0  ;;  %556 = vmatprep.subr.mxu1 %v798_v0 }
  0x7b   :  { %546 = vmatpush3.msra.mxu0 %v313_v9  ;;  %557 = vmatpush3.msra.mxu1 %v401_v23 }
 0x131   :  { %v224_v10 = vpop.f32.mrf.mxu0 }
 0x133   :  { %v531_v11 = vpop.f32.mrf.mxu0  ;;  %v298_v12 = vpop.f32.mrf.mxu1 }
 0x134   :  { %v299_v14 = vadd.f32 %v298_v12, %v224_v10 }
 0x135   :  { %v538_v15 = vpop.f32.mrf.mxu1 }
 0x136   :  { %v309_v16 = vadd.f32 %v507_v13, %v299_v14 }
 0x138   :  { %v310_v18 = vmax.f32 %v309_v16, 0.0 }
 0x13a   :  { %v312_v19 = vmul.f32 %v311_v17, %v310_v18 }
 0x13c   :  { %548 = vmatmul.mubr.msk.f32.vlgmr.msra.gmra.mxu0 %vm324_vm3, %v312_v19 }
 0x1fc   :  { %v394_v25 = vpop.f32.mrf.mxu0 }
 0x1fd   :  { %v395_v26 = vadd.f32 %v508_v24, %v394_v25 }
 0x1fe   :  { %v549_v28 = vpop.f32.mrf.mxu0 }
 0x1ff   :  { %v398_v29 = vmax.f32 %v395_v26, 0.0 }
 0x201   :  { %v400_v30 = vmul.f32 %v399_v27, %v398_v29 }
 0x203   :  { %559 = vmatmul.mubr.msk.f32.vlgmr.msra.gmra.mxu1 %vm324_vm3, %v400_v30 }
 0x2c3   :  { %v481_v32 = vpop.f32.mrf.mxu1 }
 0x2c4   :  { %v482_v33 = vadd.f32 %v510_v31, %v481_v32 }
 0x2c5   :  { %v560_v34 = vpop.f32.mrf.mxu1 }
 0x2c6   :  { %485 = vst [vmem:[#allocation17] sm:$0xff] %v482_v33 }
 0x2c7   :  { %766 = shalt.err (!%p763_p7)
}
 0x2c8   :  { %495 = dma.vmem_to_hbm [thread:$0]  %s493_s5, 128, %s923_s11, [#allocation4]  }
 0x2c9   :  { %785 = dma.done.wait [#allocation4], 128  }
 0x2ca   :  { %786 = vsyncadd [#allocation4], 4294967168 }
 0x2cb   :  { %499 = vsyncpa [#allocation3], 1 }
 0x2cc   :  { %500 = vsyncpa [#allocation6], 1 }
 0x2cd   :  { %501 = vsyncpa [#allocation9], 1 }
 0x2ce   :  { %502 = vsyncpa [#allocation12], 1 }
 0x2cf   :  { %503 = vsyncpa [#allocation15], 1 }
 0x2d0   :  { %504 = vsyncpa [#allocation4], 1 }

</bundles_post_ra>
